<compile_context>
chip_gen: v7x
topology: tpu7x:2x2x1
jax: 0.10.0
libtpu: 0.0.40
codegen_flags: <defaults>
</compile_context>

<pallas_src>
import functools

import jax
import jax.numpy as jnp
from jax.experimental import pallas as pl
from jax.experimental.pallas import tpu as pltpu


# ----------------------------- constants ----------------------------------

_LANE = 128                               # pad all feature dims to this
_VMEM_MARGIN_BYTES = 6 * 1024 * 1024      # headroom for compiler scratch/sems
_DEFAULT_VMEM_CAP = 64 * 1024 * 1024      # conservative fallback (v7x per-TC)


def _round_up(x: int, m: int) -> int:
    return ((x + m - 1) // m) * m


def _sublane(dtype) -> int:
    """Row-tile granularity: one packed vreg row-group for this dtype."""
    return max(8, 32 // jnp.dtype(dtype).itemsize)     # f32: 8, bf16: 16, int8/fp8: 32


def _vmem_capacity_bytes() -> int:
    try:
        cap = getattr(pltpu.get_tpu_info(), "vmem_capacity_bytes", None)
        if cap is not None and int(cap) > 0:
            return int(cap)
    except Exception:
        pass
    return _DEFAULT_VMEM_CAP


def _pick_tile(dim: int, candidates) -> int:
    for c in candidates:
        if c <= dim and dim % c == 0:
            return c
    return dim


def _choose_m_tiling(M: int, block_m: int, sub: int):
    """Return (M_pad, tm) with tm | M_pad, tm a multiple of `sub`, bounded
    padding, and >=2 grid steps whenever reasonable (v7x megacore)."""
    M_sub = _round_up(M, sub)
    candidates = sorted({c for c in (block_m, 512, 384, 256, 128)
                         if c <= block_m and c % sub == 0}, reverse=True)
    if not candidates:
        candidates = [_round_up(max(block_m, sub), sub)]

    # Large, nicely divisible batches: big standard tiles, no extra padding.
    for tm in candidates:
        if M_sub % tm == 0 and M_sub // tm >= 2:
            return M_sub, tm

    if M_sub <= 2 * candidates[0]:
        # Fits in at most two tiles.  Split in half (sub-rounded) so both
        # v7x TensorCores get a grid step; tiny batches stay single-tile.
        if M_sub >= 4 * sub:
            tm = _round_up((M_sub + 1) // 2, sub)
            return 2 * tm, tm
        return M_sub, M_sub

    # Large awkward batch: pad to a 128-multiple (<=127 wasted rows).
    M_pad = _round_up(M_sub, 128)
    for tm in candidates:
        if M_pad % tm == 0 and M_pad // tm >= 2:
            return M_pad, tm
    return M_pad, 128


# ----------------------------- kernels -------------------------------------


def _fused_mlp_kernel(*refs, n_layers: int, compute_dtype):
    """Whole MLP on one row-tile.  refs = (x, w0, b0, ..., w_{L-1}, b_{L-1}, out)."""
    x_ref = refs[0]
    o_ref = refs[-1]
    h = x_ref[...]                                   # already compute_dtype
    for l in range(n_layers):
        w_ref = refs[1 + 2 * l]
        b_ref = refs[2 + 2 * l]
        acc = jnp.dot(h, w_ref[...], preferred_element_type=jnp.float32)
        acc = acc + b_ref[...]                       # f32 epilogue
        if l < n_layers - 1:
            # Fused ReLU + downcast to the next layer's matmul dtype.
            h = jnp.maximum(acc, 0.0).astype(compute_dtype)
        else:
            h = acc
    o_ref[...] = h.astype(o_ref.dtype)


def _linear_tiled_kernel(x_ref, w_ref, b_ref, o_ref, acc_ref, *, apply_relu: bool):
    """One (tm, tn) output tile of y = x @ W + b, reduced over the K grid axis."""
    @pl.when(pl.program_id(2) == 0)
    def _():
        acc_ref[...] = jnp.zeros_like(acc_ref)

    acc_ref[...] += jnp.dot(x_ref[...], w_ref[...],
                            preferred_element_type=jnp.float32)

    @pl.when(pl.program_id(2) == pl.num_programs(2) - 1)
    def _():
        y = acc_ref[...] + b_ref[...]
        if apply_relu:
            y = jnp.maximum(y, 0.0)
        o_ref[...] = y.astype(o_ref.dtype)


# ----------------------------- pallas_call wrappers -------------------------


def _fused_working_set_bytes(prepared, tm, K0_pad, N_last_pad,
                             compute_dtype, out_dtype, weight_buffers):
    cdt = jnp.dtype(compute_dtype).itemsize
    odt = jnp.dtype(out_dtype).itemsize
    w_bytes = sum(w.size * w.dtype.itemsize + b.size * b.dtype.itemsize
                  for w, b, _, _ in prepared)
    max_n_pad = max(w.shape[1] for w, _, _, _ in prepared)
    ws = weight_buffers * w_bytes
    ws += 2 * tm * K0_pad * cdt                 # double-buffered x tiles
    ws += 2 * tm * N_last_pad * odt             # double-buffered out tiles
    ws += 2 * tm * max_n_pad * 4                # live f32 intermediates
    ws += tm * max_n_pad * cdt                  # downcast next-layer input
    return ws


def _mlp_fused_call(x_pad, prepared, out_dtype, tm, compute_dtype,
                    vmem_limit, single_buffer_weights):
    M_pad, K0_pad = x_pad.shape
    n_layers = len(prepared)
    N_last_pad = prepared[-1][0].shape[1]

    def _param_spec(shape):
        if single_buffer_weights:
            # Constant index_map -> a single pipeline buffer is enough.
            return pl.BlockSpec(shape, lambda i: (0, 0),
                                pipeline_mode=pl.Buffered(1))
        return pl.BlockSpec(shape, lambda i: (0, 0))

    in_specs = [pl.BlockSpec((tm, K0_pad), lambda i: (i, 0))]
    operands = [x_pad]
    flops = 0
    bytes_accessed = (x_pad.size * x_pad.dtype.itemsize
                      + M_pad * N_last_pad * jnp.dtype(out_dtype).itemsize)
    for w_t, b2, _, _ in prepared:
        kp, np_ = w_t.shape
        in_specs.append(_param_spec((kp, np_)))
        in_specs.append(_param_spec((1, np_)))
        operands += [w_t, b2]
        flops += 2 * M_pad * kp * np_
        bytes_accessed += (w_t.size * w_t.dtype.itemsize
                           + b2.size * b2.dtype.itemsize)

    kernel = functools.partial(_fused_mlp_kernel, n_layers=n_layers,
                               compute_dtype=compute_dtype)

    return pl.pallas_call(
        kernel,
        out_shape=jax.ShapeDtypeStruct((M_pad, N_last_pad), out_dtype),
        grid_spec=pltpu.PrefetchScalarGridSpec(
            num_scalar_prefetch=0,
            grid=(M_pad // tm,),
            in_specs=in_specs,
            out_specs=pl.BlockSpec((tm, N_last_pad), lambda i: (i, 0)),
        ),
        compiler_params=pltpu.CompilerParams(
            dimension_semantics=("parallel",),
            vmem_limit_bytes=vmem_limit,
        ),
        cost_estimate=pl.CostEstimate(flops=flops, transcendentals=0,
                                      bytes_accessed=bytes_accessed),
    )(*operands)


def _linear_tiled_call(x, w_t, b2, *, apply_relu, tm, out_dtype, vmem_limit):
    M_pad, K_pad = x.shape
    K_pad2, N_pad = w_t.shape
    assert K_pad == K_pad2 and M_pad % tm == 0

    # Full-width tiles when they fit; else prefer 1024/512/256 multiples so
    # the 256-wide MXU passes on v6e/v7x stay full.
    tn = N_pad if N_pad <= 1024 else _pick_tile(N_pad, (1024, 512, 384, 256, 128))
    tk = K_pad if K_pad <= 1024 else _pick_tile(K_pad, (1024, 512, 384, 256, 128))

    grid = (M_pad // tm, N_pad // tn, K_pad // tk)
    kernel = functools.partial(_linear_tiled_kernel, apply_relu=apply_relu)

    flops = 2 * M_pad * K_pad * N_pad
    bytes_accessed = (x.size * x.dtype.itemsize
                      + w_t.size * w_t.dtype.itemsize
                      + b2.size * b2.dtype.itemsize
                      + M_pad * N_pad * jnp.dtype(out_dtype).itemsize)

    return pl.pallas_call(
        kernel,
        out_shape=jax.ShapeDtypeStruct((M_pad, N_pad), out_dtype),
        grid_spec=pltpu.PrefetchScalarGridSpec(
            num_scalar_prefetch=0,
            grid=grid,
            in_specs=[
                pl.BlockSpec((tm, tk), lambda i, j, k: (i, k)),
                pl.BlockSpec((tk, tn), lambda i, j, k: (k, j)),
                pl.BlockSpec((1, tn), lambda i, j, k: (0, j)),
            ],
            out_specs=pl.BlockSpec((tm, tn), lambda i, j, k: (i, j)),
            scratch_shapes=[pltpu.VMEM((tm, tn), jnp.float32)],
        ),
        compiler_params=pltpu.CompilerParams(
            dimension_semantics=("parallel", "parallel", "arbitrary"),
            vmem_limit_bytes=vmem_limit,
        ),
        cost_estimate=pl.CostEstimate(flops=flops, transcendentals=0,
                                      bytes_accessed=bytes_accessed),
    )(x, w_t, b2)


# ----------------------------- params & forward -----------------------------


def init_mlp_params(key, feats):
    """Deterministic init matching nn.Linear shapes: W [out, in], b [out]."""
    params = []
    for m, n in zip(feats[:-1], feats[1:]):
        key, kw, kb = jax.random.split(key, 3)
        bound = 1.0 / jnp.sqrt(jnp.float32(m))
        w = jax.random.uniform(kw, (n, m), jnp.float32, -bound, bound)
        b = jax.random.uniform(kb, (n,), jnp.float32, -bound, bound)
        params.append((w, b))
    return params


def prepare_mlp_params(params, compute_dtype=jnp.bfloat16):
    """One-time glue (outside the hot path): transpose to [in, out], zero-pad
    all dims to multiples of 128 (lane-dense), cast weights to the matmul
    compute dtype (bf16 by default: MXU-native, half the HBM bytes);
    biases stay f32 for the f32 epilogue."""
    prepared = []
    for w, b in params:
        n, m = w.shape                         # nn.Linear layout: [out, in]
        m_pad, n_pad = _round_up(m, _LANE), _round_up(n, _LANE)
        w_t = jnp.zeros((m_pad, n_pad), compute_dtype).at[:m, :n].set(
            w.T.astype(compute_dtype))
        b2 = jnp.zeros((1, n_pad), jnp.float32).at[0, :n].set(
            b.astype(jnp.float32))
        prepared.append((w_t, b2, m, n))
    return prepared


def mlp_forward(x, prepared, *, block_m=512, force_tiled=False,
                activation_dtype=jnp.bfloat16):
    """Mirrors MLP.forward: ReLU after every layer except the last."""
    M, K = x.shape
    n_layers = len(prepared)
    compute_dtype = prepared[0][0].dtype
    K0_pad = prepared[0][0].shape[0]
    N_last = prepared[-1][3]
    N_last_pad = prepared[-1][0].shape[1]
    max_n_pad = max(w.shape[1] for w, _, _, _ in prepared)

    # Cap the row tile when hidden widths are large (bounds the f32
    # intermediate footprint, important on v7x's 64 MiB VMEM).
    if max_n_pad >= 4096:
        block_m = min(block_m, 256)

    sub = _sublane(compute_dtype)
    M_pad, tm = _choose_m_tiling(M, block_m, sub)

    x_pad = jnp.zeros((M_pad, K0_pad), compute_dtype).at[:M, :K].set(
        x.astype(compute_dtype))

    vmem_cap = _vmem_capacity_bytes()
    vmem_limit = (vmem_cap * 3) // 4       # ~96 MiB on v5e/v6e, ~48 MiB on v7x

    out = None
    if not force_tiled:
        # Prefer single-buffered weights (constant index_map); fall back to
        # default double-buffering, then to the tiled per-layer path.
        for single_buf in (True, False):
            ws = _fused_working_set_bytes(prepared, tm, K0_pad, N_last_pad,
                                          compute_dtype, x.dtype,
                                          weight_buffers=1 if single_buf else 2)
            if ws + _VMEM_MARGIN_BYTES > vmem_limit:
                continue
            try:
                out = _mlp_fused_call(x_pad, prepared, x.dtype, tm,
                                      compute_dtype, vmem_limit,
                                      single_buffer_weights=single_buf)
                break
            except Exception:
                out = None

    if out is None:
        # Size-robust fallback: one tiled (M, N, K) pallas_call per layer.
        # Inter-layer activations stored in bf16 to halve the HBM round trip.
        h = x_pad
        for idx, (w_t, b2, _, _) in enumerate(prepared):
            apply_relu = idx < n_layers - 1
            o_dt = activation_dtype if apply_relu else jnp.float32
            h = _linear_tiled_call(h, w_t, b2, apply_relu=apply_relu,
                                   tm=tm, out_dtype=o_dt,
                                   vmem_limit=vmem_limit)
        out = h

    return out[:M, :N_last].astype(x.dtype)


def mlp_reference(x, params):
    n_layers = len(params)
    for idx, (w, b) in enumerate(params):
        x = x @ w.T + b
        if idx < n_layers - 1:
            x = jnp.maximum(x, 0.0)
    return x


# ----------------------------- test ------------------------------------------

if __name__ == "__main__":
    key = jax.random.PRNGKey(0)

    # MLP([32, 64, 64, 16]) at small test shapes.
    feats = [32, 64, 64, 16]
    batch = 8

    key, kx = jax.random.split(key)
    x = jax.random.normal(kx, (batch, feats[0]), jnp.float32)
    params = init_mlp_params(key, feats)
    ref = mlp_reference(x, params)

    # 1) Default bf16 fused path (whole MLP in one pallas_call, f32 accumulate).
    prepared_bf16 = prepare_mlp_params(params)           # bf16 by default
    out_bf16 = jax.block_until_ready(mlp_forward(x, prepared_bf16))
    assert out_bf16.shape == (batch, feats[-1])
    assert jnp.allclose(out_bf16, ref, atol=5e-2, rtol=5e-2)

    # 2) f32 compute path (tight tolerance).
    prepared_f32 = prepare_mlp_params(params, compute_dtype=jnp.float32)
    out_f32 = jax.block_until_ready(mlp_forward(x, prepared_f32))
    assert out_f32.shape == (batch, feats[-1])
    assert jnp.allclose(out_f32, ref, atol=1e-5, rtol=1e-5)

    # 3) Tiled per-layer fallback path (K-reduction grid axis + bf16
    #    inter-layer activations exercised).
    feats_big = [256, 384, 128]
    batch_big = 160
    key, kx2, kp2 = jax.random.split(key, 3)
    x_big = jax.random.normal(kx2, (batch_big, feats_big[0]), jnp.float32)
    params_big = init_mlp_params(kp2, feats_big)
    prepared_big = prepare_mlp_params(params_big)         # bf16 weights
    out_big = jax.block_until_ready(
        mlp_forward(x_big, prepared_big, force_tiled=True))
    ref_big = mlp_reference(x_big, params_big)
    assert out_big.shape == (batch_big, feats_big[-1])
    assert jnp.allclose(out_big, ref_big, atol=1e-1, rtol=1e-1)

    print("KERNEL_OK")
</pallas_src>

<mosaic_0001>
module attributes {stable_mosaic.version = 11 : i64} {
  func.func @_fused_mlp_kernel(%arg0: i32, %arg1: memref<16x128xbf16, #tpu.memory_space<vmem>>, %arg2: memref<128x128xbf16, #tpu.memory_space<vmem>>, %arg3: memref<1x128xf32, #tpu.memory_space<vmem>>, %arg4: memref<128x128xbf16, #tpu.memory_space<vmem>>, %arg5: memref<1x128xf32, #tpu.memory_space<vmem>>, %arg6: memref<128x128xbf16, #tpu.memory_space<vmem>>, %arg7: memref<1x128xf32, #tpu.memory_space<vmem>>, %arg8: memref<16x128xf32, #tpu.memory_space<vmem>>) attributes {dimension_semantics = [#tpu.dimension_semantics<parallel>], iteration_bounds = array<i64: 1>, scalar_prefetch = 0 : i64, scratch_operands = 0 : i64, tpu.core_type = #tpu.core_type<tc>, window_params = [{transform_indices = @transform_0, window_bounds = array<i64: 16, 128>}, {pipeline_mode = #tpu.pipeline_mode<synchronous>, transform_indices = @transform_1, window_bounds = array<i64: 128, 128>}, {pipeline_mode = #tpu.pipeline_mode<synchronous>, transform_indices = @transform_2, window_bounds = array<i64: 1, 128>}, {pipeline_mode = #tpu.pipeline_mode<synchronous>, transform_indices = @transform_3, window_bounds = array<i64: 128, 128>}, {pipeline_mode = #tpu.pipeline_mode<synchronous>, transform_indices = @transform_4, window_bounds = array<i64: 1, 128>}, {pipeline_mode = #tpu.pipeline_mode<synchronous>, transform_indices = @transform_5, window_bounds = array<i64: 128, 128>}, {pipeline_mode = #tpu.pipeline_mode<synchronous>, transform_indices = @transform_6, window_bounds = array<i64: 1, 128>}, {transform_indices = @transform_7, window_bounds = array<i64: 16, 128>}]} {
    %c0 = arith.constant 0 : index
    %c0_0 = arith.constant 0 : index
    %0 = vector.load %arg1[%c0, %c0_0] : memref<16x128xbf16, #tpu.memory_space<vmem>>, vector<16x128xbf16>
    %c0_1 = arith.constant 0 : index
    %c0_2 = arith.constant 0 : index
    %1 = vector.load %arg2[%c0_1, %c0_2] : memref<128x128xbf16, #tpu.memory_space<vmem>>, vector<128x128xbf16>
    %cst = arith.constant dense<0.000000e+00> : vector<16x128xf32>
    %2 = tpu.matmul %0, %1, %cst {dimension_numbers = #tpu.dot_dimension_numbers<[1], [0], [0], [1], [0, 0, 1, 1], [], []>} : vector<16x128xbf16>, vector<128x128xbf16>, vector<16x128xf32> -> vector<16x128xf32>
    %c0_3 = arith.constant 0 : index
    %c0_4 = arith.constant 0 : index
    %3 = vector.load %arg3[%c0_3, %c0_4] : memref<1x128xf32, #tpu.memory_space<vmem>>, vector<1x128xf32>
    %4 = vector.broadcast %3 : vector<1x128xf32> to vector<16x128xf32>
    %5 = arith.addf %2, %4 : vector<16x128xf32>
    %cst_5 = arith.constant 0.000000e+00 : f32
    %6 = vector.broadcast %cst_5 : f32 to vector<16x128xf32>
    %7 = arith.maximumf %5, %6 : vector<16x128xf32>
    %8 = arith.truncf %7 : vector<16x128xf32> to vector<16x128xbf16>
    %c0_6 = arith.constant 0 : index
    %c0_7 = arith.constant 0 : index
    %9 = vector.load %arg4[%c0_6, %c0_7] : memref<128x128xbf16, #tpu.memory_space<vmem>>, vector<128x128xbf16>
    %cst_8 = arith.constant dense<0.000000e+00> : vector<16x128xf32>
    %10 = tpu.matmul %8, %9, %cst_8 {dimension_numbers = #tpu.dot_dimension_numbers<[1], [0], [0], [1], [0, 0, 1, 1], [], []>} : vector<16x128xbf16>, vector<128x128xbf16>, vector<16x128xf32> -> vector<16x128xf32>
    %c0_9 = arith.constant 0 : index
    %c0_10 = arith.constant 0 : index
    %11 = vector.load %arg5[%c0_9, %c0_10] : memref<1x128xf32, #tpu.memory_space<vmem>>, vector<1x128xf32>
    %12 = vector.broadcast %11 : vector<1x128xf32> to vector<16x128xf32>
    %13 = arith.addf %10, %12 : vector<16x128xf32>
    %cst_11 = arith.constant 0.000000e+00 : f32
    %14 = vector.broadcast %cst_11 : f32 to vector<16x128xf32>
    %15 = arith.maximumf %13, %14 : vector<16x128xf32>
    %16 = arith.truncf %15 : vector<16x128xf32> to vector<16x128xbf16>
    %c0_12 = arith.constant 0 : index
    %c0_13 = arith.constant 0 : index
    %17 = vector.load %arg6[%c0_12, %c0_13] : memref<128x128xbf16, #tpu.memory_space<vmem>>, vector<128x128xbf16>
    %cst_14 = arith.constant dense<0.000000e+00> : vector<16x128xf32>
    %18 = tpu.matmul %16, %17, %cst_14 {dimension_numbers = #tpu.dot_dimension_numbers<[1], [0], [0], [1], [0, 0, 1, 1], [], []>} : vector<16x128xbf16>, vector<128x128xbf16>, vector<16x128xf32> -> vector<16x128xf32>
    %c0_15 = arith.constant 0 : index
    %c0_16 = arith.constant 0 : index
    %19 = vector.load %arg7[%c0_15, %c0_16] : memref<1x128xf32, #tpu.memory_space<vmem>>, vector<1x128xf32>
    %20 = vector.broadcast %19 : vector<1x128xf32> to vector<16x128xf32>
    %21 = arith.addf %18, %20 : vector<16x128xf32>
    %c0_17 = arith.constant 0 : index
    %c0_18 = arith.constant 0 : index
    %22 = vector.load %arg8[%c0_17, %c0_18] : memref<16x128xf32, #tpu.memory_space<vmem>>, vector<16x128xf32>
    tpu.vector_store %arg8[%c0_17, %c0_18], %21 {strides = array<i32>} : memref<16x128xf32, #tpu.memory_space<vmem>>, vector<16x128xf32>,
    return
  }
  func.func @transform_0(%arg0: i32) -> (i32, i32) {
    %c0_i32 = arith.constant 0 : i32
    %c0_i32_0 = arith.constant 0 : i32
    return %arg0, %c0_i32 : i32, i32
  }
  func.func @transform_1(%arg0: i32) -> (i32, i32) {
    %c0_i32 = arith.constant 0 : i32
    %c0_i32_0 = arith.constant 0 : i32
    %c0_i32_1 = arith.constant 0 : i32
    return %c0_i32, %c0_i32_0 : i32, i32
  }
  func.func @transform_2(%arg0: i32) -> (i32, i32) {
    %c0_i32 = arith.constant 0 : i32
    %c0_i32_0 = arith.constant 0 : i32
    %c0_i32_1 = arith.constant 0 : i32
    return %c0_i32, %c0_i32_0 : i32, i32
  }
  func.func @transform_3(%arg0: i32) -> (i32, i32) {
    %c0_i32 = arith.constant 0 : i32
    %c0_i32_0 = arith.constant 0 : i32
    %c0_i32_1 = arith.constant 0 : i32
    return %c0_i32, %c0_i32_0 : i32, i32
  }
  func.func @transform_4(%arg0: i32) -> (i32, i32) {
    %c0_i32 = arith.constant 0 : i32
    %c0_i32_0 = arith.constant 0 : i32
    %c0_i32_1 = arith.constant 0 : i32
    return %c0_i32, %c0_i32_0 : i32, i32
  }
  func.func @transform_5(%arg0: i32) -> (i32, i32) {
    %c0_i32 = arith.constant 0 : i32
    %c0_i32_0 = arith.constant 0 : i32
    %c0_i32_1 = arith.constant 0 : i32
    return %c0_i32, %c0_i32_0 : i32, i32
  }
  func.func @transform_6(%arg0: i32) -> (i32, i32) {
    %c0_i32 = arith.constant 0 : i32
    %c0_i32_0 = arith.constant 0 : i32
    %c0_i32_1 = arith.constant 0 : i32
    return %c0_i32, %c0_i32_0 : i32, i32
  }
  func.func @transform_7(%arg0: i32) -> (i32, i32) {
    %c0_i32 = arith.constant 0 : i32
    %c0_i32_0 = arith.constant 0 : i32
    return %arg0, %c0_i32 : i32, i32
  }
}

module attributes {stable_mosaic.version = 11 : i64} {
  func.func @_fused_mlp_kernel(%arg0: i32, %arg1: memref<16x128xbf16, #tpu.memory_space<vmem>>, %arg2: memref<128x128xbf16, #tpu.memory_space<vmem>>, %arg3: memref<1x128xf32, #tpu.memory_space<vmem>>, %arg4: memref<128x128xbf16, #tpu.memory_space<vmem>>, %arg5: memref<1x128xf32, #tpu.memory_space<vmem>>, %arg6: memref<128x128xbf16, #tpu.memory_space<vmem>>, %arg7: memref<1x128xf32, #tpu.memory_space<vmem>>, %arg8: memref<16x128xf32, #tpu.memory_space<vmem>>) attributes {dimension_semantics = [#tpu.dimension_semantics<parallel>], iteration_bounds = array<i64: 1>, scalar_prefetch = 0 : i64, scratch_operands = 0 : i64, tpu.core_type = #tpu.core_type<tc>, window_params = [{transform_indices = @transform_0, window_bounds = array<i64: 16, 128>}, {pipeline_mode = #tpu.pipeline_mode<synchronous>, transform_indices = @transform_1, window_bounds = array<i64: 128, 128>}, {pipeline_mode = #tpu.pipeline_mode<synchronous>, transform_indices = @transform_2, window_bounds = array<i64: 1, 128>}, {pipeline_mode = #tpu.pipeline_mode<synchronous>, transform_indices = @transform_3, window_bounds = array<i64: 128, 128>}, {pipeline_mode = #tpu.pipeline_mode<synchronous>, transform_indices = @transform_4, window_bounds = array<i64: 1, 128>}, {pipeline_mode = #tpu.pipeline_mode<synchronous>, transform_indices = @transform_5, window_bounds = array<i64: 128, 128>}, {pipeline_mode = #tpu.pipeline_mode<synchronous>, transform_indices = @transform_6, window_bounds = array<i64: 1, 128>}, {transform_indices = @transform_7, window_bounds = array<i64: 16, 128>}]} {
    %c0 = arith.constant 0 : index
    %c0_0 = arith.constant 0 : index
    %0 = vector.load %arg1[%c0, %c0_0] : memref<16x128xbf16, #tpu.memory_space<vmem>>, vector<16x128xbf16>
    %c0_1 = arith.constant 0 : index
    %c0_2 = arith.constant 0 : index
    %1 = vector.load %arg2[%c0_1, %c0_2] : memref<128x128xbf16, #tpu.memory_space<vmem>>, vector<128x128xbf16>
    %cst = arith.constant dense<0.000000e+00> : vector<16x128xf32>
    %2 = tpu.matmul %0, %1, %cst {dimension_numbers = #tpu.dot_dimension_numbers<[1], [0], [0], [1], [0, 0, 1, 1], [], []>} : vector<16x128xbf16>, vector<128x128xbf16>, vector<16x128xf32> -> vector<16x128xf32>
    %c0_3 = arith.constant 0 : index
    %c0_4 = arith.constant 0 : index
    %3 = vector.load %arg3[%c0_3, %c0_4] : memref<1x128xf32, #tpu.memory_space<vmem>>, vector<1x128xf32>
    %4 = vector.broadcast %3 : vector<1x128xf32> to vector<16x128xf32>
    %5 = arith.addf %2, %4 : vector<16x128xf32>
    %cst_5 = arith.constant 0.000000e+00 : f32
    %6 = vector.broadcast %cst_5 : f32 to vector<16x128xf32>
    %7 = arith.maximumf %5, %6 : vector<16x128xf32>
    %8 = arith.truncf %7 : vector<16x128xf32> to vector<16x128xbf16>
    %c0_6 = arith.constant 0 : index
    %c0_7 = arith.constant 0 : index
    %9 = vector.load %arg4[%c0_6, %c0_7] : memref<128x128xbf16, #tpu.memory_space<vmem>>, vector<128x128xbf16>
    %cst_8 = arith.constant dense<0.000000e+00> : vector<16x128xf32>
    %10 = tpu.matmul %8, %9, %cst_8 {dimension_numbers = #tpu.dot_dimension_numbers<[1], [0], [0], [1], [0, 0, 1, 1], [], []>} : vector<16x128xbf16>, vector<128x128xbf16>, vector<16x128xf32> -> vector<16x128xf32>
    %c0_9 = arith.constant 0 : index
    %c0_10 = arith.constant 0 : index
    %11 = vector.load %arg5[%c0_9, %c0_10] : memref<1x128xf32, #tpu.memory_space<vmem>>, vector<1x128xf32>
    %12 = vector.broadcast %11 : vector<1x128xf32> to vector<16x128xf32>
    %13 = arith.addf %10, %12 : vector<16x128xf32>
    %cst_11 = arith.constant 0.000000e+00 : f32
    %14 = vector.broadcast %cst_11 : f32 to vector<16x128xf32>
    %15 = arith.maximumf %13, %14 : vector<16x128xf32>
    %16 = arith.truncf %15 : vector<16x128xf32> to vector<16x128xbf16>
    %c0_12 = arith.constant 0 : index
    %c0_13 = arith.constant 0 : index
    %17 = vector.load %arg6[%c0_12, %c0_13] : memref<128x128xbf16, #tpu.memory_space<vmem>>, vector<128x128xbf16>
    %cst_14 = arith.constant dense<0.000000e+00> : vector<16x128xf32>
    %18 = tpu.matmul %16, %17, %cst_14 {dimension_numbers = #tpu.dot_dimension_numbers<[1], [0], [0], [1], [0, 0, 1, 1], [], []>} : vector<16x128xbf16>, vector<128x128xbf16>, vector<16x128xf32> -> vector<16x128xf32>
    %c0_15 = arith.constant 0 : index
    %c0_16 = arith.constant 0 : index
    %19 = vector.load %arg7[%c0_15, %c0_16] : memref<1x128xf32, #tpu.memory_space<vmem>>, vector<1x128xf32>
    %20 = vector.broadcast %19 : vector<1x128xf32> to vector<16x128xf32>
    %21 = arith.addf %18, %20 : vector<16x128xf32>
    %c0_17 = arith.constant 0 : index
    %c0_18 = arith.constant 0 : index
    %22 = vector.load %arg8[%c0_17, %c0_18] : memref<16x128xf32, #tpu.memory_space<vmem>>, vector<16x128xf32>
    tpu.vector_store %arg8[%c0_17, %c0_18], %21 {strides = array<i32>} : memref<16x128xf32, #tpu.memory_space<vmem>>, vector<16x128xf32>,
    return
  }
  func.func @transform_0(%arg0: i32) -> (i32, i32) {
    %c0_i32 = arith.constant 0 : i32
    %c0_i32_0 = arith.constant 0 : i32
    return %arg0, %c0_i32 : i32, i32
  }
  func.func @transform_1(%arg0: i32) -> (i32, i32) {
    %c0_i32 = arith.constant 0 : i32
    %c0_i32_0 = arith.constant 0 : i32
    %c0_i32_1 = arith.constant 0 : i32
    return %c0_i32, %c0_i32_0 : i32, i32
  }
  func.func @transform_2(%arg0: i32) -> (i32, i32) {
    %c0_i32 = arith.constant 0 : i32
    %c0_i32_0 = arith.constant 0 : i32
    %c0_i32_1 = arith.constant 0 : i32
    return %c0_i32, %c0_i32_0 : i32, i32
  }
  func.func @transform_3(%arg0: i32) -> (i32, i32) {
    %c0_i32 = arith.constant 0 : i32
    %c0_i32_0 = arith.constant 0 : i32
    %c0_i32_1 = arith.constant 0 : i32
    return %c0_i32, %c0_i32_0 : i32, i32
  }
  func.func @transform_4(%arg0: i32) -> (i32, i32) {
    %c0_i32 = arith.constant 0 : i32
    %c0_i32_0 = arith.constant 0 : i32
    %c0_i32_1 = arith.constant 0 : i32
    return %c0_i32, %c0_i32_0 : i32, i32
  }
  func.func @transform_5(%arg0: i32) -> (i32, i32) {
    %c0_i32 = arith.constant 0 : i32
    %c0_i32_0 = arith.constant 0 : i32
    %c0_i32_1 = arith.constant 0 : i32
    return %c0_i32, %c0_i32_0 : i32, i32
  }
  func.func @transform_6(%arg0: i32) -> (i32, i32) {
    %c0_i32 = arith.constant 0 : i32
    %c0_i32_0 = arith.constant 0 : i32
    %c0_i32_1 = arith.constant 0 : i32
    return %c0_i32, %c0_i32_0 : i32, i32
  }
  func.func @transform_7(%arg0: i32) -> (i32, i32) {
    %c0_i32 = arith.constant 0 : i32
    %c0_i32_0 = arith.constant 0 : i32
    return %arg0, %c0_i32 : i32, i32
  }
}

module attributes {stable_mosaic.version = 11 : i64} {
  func.func @_linear_tiled_kernel(%arg0: i32, %arg1: i32, %arg2: i32, %arg3: memref<16x128xbf16, #tpu.memory_space<vmem>>, %arg4: memref<128x128xbf16, #tpu.memory_space<vmem>>, %arg5: memref<1x128xf32, #tpu.memory_space<vmem>>, %arg6: memref<16x128xbf16, #tpu.memory_space<vmem>>, %arg7: memref<16x128xf32, #tpu.memory_space<vmem>>) attributes {dimension_semantics = [#tpu.dimension_semantics<parallel>, #tpu.dimension_semantics<parallel>, #tpu.dimension_semantics<arbitrary>], iteration_bounds = array<i64: 1, 1, 1>, scalar_prefetch = 0 : i64, scratch_operands = 1 : i64, tpu.core_type = #tpu.core_type<tc>, window_params = [{transform_indices = @transform_0, window_bounds = array<i64: 16, 128>}, {transform_indices = @transform_1, window_bounds = array<i64: 128, 128>}, {transform_indices = @transform_2, window_bounds = array<i64: 1, 128>}, {transform_indices = @transform_3, window_bounds = array<i64: 16, 128>}]} {
    %c0_i32 = arith.constant 0 : i32
    %0 = arith.cmpi eq, %arg2, %c0_i32 : i32
    %1 = arith.extui %0 : i1 to i32
    %c0_i32_0 = arith.constant 0 : i32
    %2 = arith.cmpi ne, %1, %c0_i32_0 : i32
    scf.if %2 {
      %cst_10 = arith.constant 0.000000e+00 : f32
      %12 = vector.broadcast %cst_10 : f32 to vector<16x128xf32>
      %c0_11 = arith.constant 0 : index
      %c0_12 = arith.constant 0 : index
      %13 = vector.load %arg7[%c0_11, %c0_12] : memref<16x128xf32, #tpu.memory_space<vmem>>, vector<16x128xf32>
      tpu.vector_store %arg7[%c0_11, %c0_12], %12 {strides = array<i32>} : memref<16x128xf32, #tpu.memory_space<vmem>>, vector<16x128xf32>,
    } else {
    }
    %c0 = arith.constant 0 : index
    %c0_1 = arith.constant 0 : index
    %3 = vector.load %arg7[%c0, %c0_1] : memref<16x128xf32, #tpu.memory_space<vmem>>, vector<16x128xf32>
    %c0_2 = arith.constant 0 : index
    %c0_3 = arith.constant 0 : index
    %4 = vector.load %arg3[%c0_2, %c0_3] : memref<16x128xbf16, #tpu.memory_space<vmem>>, vector<16x128xbf16>
    %c0_4 = arith.constant 0 : index
    %c0_5 = arith.constant 0 : index
    %5 = vector.load %arg4[%c0_4, %c0_5] : memref<128x128xbf16, #tpu.memory_space<vmem>>, vector<128x128xbf16>
    %cst = arith.constant dense<0.000000e+00> : vector<16x128xf32>
    %6 = tpu.matmul %4, %5, %cst {dimension_numbers = #tpu.dot_dimension_numbers<[1], [0], [0], [1], [0, 0, 1, 1], [], []>} : vector<16x128xbf16>, vector<128x128xbf16>, vector<16x128xf32> -> vector<16x128xf32>
    %7 = arith.addf %3, %6 : vector<16x128xf32>
    %c0_6 = arith.constant 0 : index
    %c0_7 = arith.constant 0 : index
    %8 = vector.load %arg7[%c0_6, %c0_7] : memref<16x128xf32, #tpu.memory_space<vmem>>, vector<16x128xf32>
    tpu.vector_store %arg7[%c0_6, %c0_7], %7 {strides = array<i32>} : memref<16x128xf32, #tpu.memory_space<vmem>>, vector<16x128xf32>,
    %c0_i32_8 = arith.constant 0 : i32
    %9 = arith.cmpi eq, %arg2, %c0_i32_8 : i32
    %10 = arith.extui %9 : i1 to i32
    %c0_i32_9 = arith.constant 0 : i32
    %11 = arith.cmpi ne, %10, %c0_i32_9 : i32
    scf.if %11 {
      %c0_10 = arith.constant 0 : index
      %c0_11 = arith.constant 0 : index
      %12 = vector.load %arg7[%c0_10, %c0_11] : memref<16x128xf32, #tpu.memory_space<vmem>>, vector<16x128xf32>
      %c0_12 = arith.constant 0 : index
      %c0_13 = arith.constant 0 : index
      %13 = vector.load %arg5[%c0_12, %c0_13] : memref<1x128xf32, #tpu.memory_space<vmem>>, vector<1x128xf32>
      %14 = vector.broadcast %13 : vector<1x128xf32> to vector<16x128xf32>
      %15 = arith.addf %12, %14 : vector<16x128xf32>
      %cst_14 = arith.constant 0.000000e+00 : f32
      %16 = vector.broadcast %cst_14 : f32 to vector<16x128xf32>
      %17 = arith.maximumf %15, %16 : vector<16x128xf32>
      %18 = arith.truncf %17 : vector<16x128xf32> to vector<16x128xbf16>
      %c0_15 = arith.constant 0 : index
      %c0_16 = arith.constant 0 : index
      %19 = vector.load %arg6[%c0_15, %c0_16] : memref<16x128xbf16, #tpu.memory_space<vmem>>, vector<16x128xbf16>
      tpu.vector_store %arg6[%c0_15, %c0_16], %18 {strides = array<i32>} : memref<16x128xbf16, #tpu.memory_space<vmem>>, vector<16x128xbf16>,
    } else {
    }
    return
  }
  func.func @transform_0(%arg0: i32, %arg1: i32, %arg2: i32) -> (i32, i32) {
    %c0_i32 = arith.constant 0 : i32
    return %arg0, %arg2 : i32, i32
  }
  func.func @transform_1(%arg0: i32, %arg1: i32, %arg2: i32) -> (i32, i32) {
    %c0_i32 = arith.constant 0 : i32
    return %arg2, %arg1 : i32, i32
  }
  func.func @transform_2(%arg0: i32, %arg1: i32, %arg2: i32) -> (i32, i32) {
    %c0_i32 = arith.constant 0 : i32
    %c0_i32_0 = arith.constant 0 : i32
    return %c0_i32, %arg1 : i32, i32
  }
  func.func @transform_3(%arg0: i32, %arg1: i32, %arg2: i32) -> (i32, i32) {
    %c0_i32 = arith.constant 0 : i32
    return %arg0, %arg1 : i32, i32
  }
}

</mosaic_0001>

<bundles_post_ra>
// kernel: tpu_custom_call.1
= control target key start
LH: loop header
LB: loop body
LE: loop exit
PB: predicated region body
PF: predicated region fallthrough
CT: control target
= control target key end

     0   :  { %12 = vsyncpa [#allocation3], 0  ;;  %s899_s0 = inlined_call_operand.hbm [shape: bf16[16,128], index: 0, kind: input, shape index: {}]   ;;  %s900_s1 = inlined_call_operand.hbm [shape: bf16[128,128], index: 1, kind: input, shape index: {}]   ;;  %s901_s2 = inlined_call_operand.vmem [shape: f32[1,128], index: 2, kind: input, shape index: {}]   ;;  %s902_s3 = inlined_call_operand.hbm [shape: bf16[128,128], index: 3, kind: input, shape index: {}]   ;;  %s903_s4 = inlined_call_operand.vmem [shape: f32[1,128], index: 4, kind: input, shape index: {}]   ;;  %s904_s5 = inlined_call_operand.hbm [shape: bf16[128,128], index: 5, kind: input, shape index: {}]   ;;  %s905_s6 = inlined_call_operand.vmem [shape: f32[1,128], index: 6, kind: input, shape index: {}]   ;;  %s906_s7 = inlined_call_operand.hbm [shape: f32[16,128], index: 7, kind: output, shape index: {}]  }
   0x1   :  { %13 = vsyncpa [#allocation6], 0 }
   0x2   :  { %14 = vsyncpa [#allocation9], 0 }
   0x3   :  { %15 = vsyncpa [#allocation4], 0  ;;  %s723_s24 = smov [#allocation5]   ;;  %s724_s26 = smov [#allocation2]  }
   0x4   :  { %s33_s25 = sshll.u32 %s723_s24, 4  ;;  %s21_s27 = sshll.u32 %s724_s26, 4  ;;  %s34_s25 = int_to_ptr.vmem [resolvable:$true] %s33_s25  ;;  %s774_s27 = int_to_ptr.vmem [resolvable:$true] %s21_s27 }
   0x5   :  { %s605_s30 = scalar_lea.hbm %s900_s1, 1024 }
   0x6   :  { %p606_p0 = scmp.ne.s32.totalorder %s900_s1, %s605_s30  ;;  %p609_p1 = scmp.lt.u32.totalorder %s605_s30, %s900_s1 }
   0x8   :  { %p611_p2 = pnand %p609_p1, %p606_p0 }
   0xa   :  { %614 = shalt.err (!%p611_p2)
}
   0xb   :  { %s615_s12 = scalar_lea.vmem %s34_s25, 1024  ;;  %p620_p4 = scmp.lt.s32.totalorder %s34_s25, %s34_s25 }
   0xc   :  { %p616_p3 = scmp.ne.s32.totalorder %s34_s25, %s615_s12  ;;  %p621_p5 = scmp.lt.s32.totalorder %s615_s12, %s615_s12 }
   0xe   :  { %p622_p6 = por %p621_p5, %p620_p4 }
  0x10   :  { %p623_p7 = pnand %p622_p6, %p616_p3 }
  0x12   :  { %626 = shalt.err (!%p623_p7)
}
  0x13   :  { %s725_s13 = smov 64   ;;  %s726_s14 = smov 4  }
  0x14   :  { %39 = dma.hbm_to_vmem [thread:$0]  %s900_s1, 1024, %s34_s25, [#allocation6], %s725_s13, %s725_s13, %s726_s14  }
  0x15   :  { %s627_s19 = scalar_lea.hbm %s899_s0, 128 }
  0x16   :  { %p628_p8 = scmp.ne.s32.totalorder %s899_s0, %s627_s19  ;;  %p631_p9 = scmp.lt.u32.totalorder %s627_s19, %s899_s0 }
  0x18   :  { %p633_p10 = pnand %p631_p9, %p628_p8 }
  0x1a   :  { %636 = shalt.err (!%p633_p10)
}
  0x1b   :  { %s637_s24 = scalar_lea.vmem %s774_s27, 128  ;;  %p642_p12 = scmp.lt.s32.totalorder %s774_s27, %s774_s27 }
  0x1c   :  { %p638_p11 = scmp.ne.s32.totalorder %s774_s27, %s637_s24  ;;  %p643_p13 = scmp.lt.s32.totalorder %s637_s24, %s637_s24 }
  0x1e   :  { %p644_p0 = por %p643_p13, %p642_p12 }
  0x20   :  { %p645_p1 = pnand %p644_p0, %p638_p11 }
  0x22   :  { %648 = shalt.err (!%p645_p1)
}
  0x23   :  { %27 = dma.hbm_to_vmem [thread:$0]  %s899_s0, 128, %s774_s27, [#allocation3], %s725_s13, %s725_s13, %s726_s14  }
  0x24   :  { %s727_s26 = smov [#allocation7]   ;;  %s728_s29 = smov [#allocation8]  }
  0x25   :  { %s47_s28 = sshll.u32 %s727_s26, 4  ;;  %s61_s30 = sshll.u32 %s728_s29, 4  ;;  %s48_s28 = int_to_ptr.vmem [resolvable:$true] %s47_s28  ;;  %s811_s30 = int_to_ptr.vmem [resolvable:$true] %s61_s30 }
  0x26   :  { %s649_s10 = scalar_lea.hbm %s902_s3, 1024 }
  0x27   :  { %p650_p2 = scmp.ne.s32.totalorder %s902_s3, %s649_s10  ;;  %p653_p3 = scmp.lt.u32.totalorder %s649_s10, %s902_s3 }
  0x29   :  { %p655_p4 = pnand %p653_p3, %p650_p2 }
  0x2b   :  { %658 = shalt.err (!%p655_p4)
}
  0x2c   :  { %s659_s0 = scalar_lea.vmem %s48_s28, 1024  ;;  %p664_p6 = scmp.lt.s32.totalorder %s48_s28, %s48_s28 }
  0x2d   :  { %p660_p5 = scmp.ne.s32.totalorder %s48_s28, %s659_s0  ;;  %p665_p7 = scmp.lt.s32.totalorder %s659_s0, %s659_s0 }
  0x2f   :  { %p666_p8 = por %p665_p7, %p664_p6 }
  0x31   :  { %p667_p9 = pnand %p666_p8, %p660_p5 }
  0x33   :  { %670 = shalt.err (!%p667_p9)
}
  0x34   :  { %53 = dma.hbm_to_vmem [thread:$0]  %s902_s3, 1024, %s48_s28, [#allocation6], %s725_s13, %s725_s13, %s726_s14  }
  0x35   :  { %s671_s20 = scalar_lea.hbm %s904_s5, 1024 }
  0x36   :  { %p672_p10 = scmp.ne.s32.totalorder %s904_s5, %s671_s20  ;;  %p675_p11 = scmp.lt.u32.totalorder %s671_s20, %s904_s5 }
  0x38   :  { %p677_p12 = pnand %p675_p11, %p672_p10 }
  0x3a   :  { %680 = shalt.err (!%p677_p12)
}
  0x3b   :  { %s681_s1 = scalar_lea.vmem %s811_s30, 1024  ;;  %p686_p0 = scmp.lt.s32.totalorder %s811_s30, %s811_s30 }
  0x3c   :  { %p682_p13 = scmp.ne.s32.totalorder %s811_s30, %s681_s1  ;;  %p687_p1 = scmp.lt.s32.totalorder %s681_s1, %s681_s1 }
  0x3e   :  { %p688_p2 = por %p687_p1, %p686_p0 }
  0x40   :  { %p689_p3 = pnand %p688_p2, %p682_p13 }
  0x42   :  { %692 = shalt.err (!%p689_p3)
}
  0x43   :  { %67 = dma.hbm_to_vmem [thread:$0]  %s904_s5, 1024, %s811_s30, [#allocation9], %s725_s13, %s725_s13, %s726_s14  }
  0x44   :  { %715 = dma.done.wait [#allocation3], 128  }
  0x45   :  { %716 = vsyncadd [#allocation3], 4294967168 }
  0x46   :  { %717 = dma.done.wait [#allocation6], 2048  }
  0x47   :  { %718 = vsyncadd [#allocation6], 4294965248 }
  0x48   :  { %719 = dma.done.wait [#allocation9], 1024  }
  0x49   :  { %720 = vsyncadd [#allocation9], 4294966272  ;;  %v729_v0 = vmov 0.0   ;;  %vm730_vm0 = vmmov 0   ;;  %v580_v1 = vld [vmem:[#allocation5] sm:$0xff]   ;;  %v581_v2 = vld [vmem:[#allocation5 + $0x8] sm:$0xff]  }
  0x4a   :  { %509 = vmatprep.subr.bf16.mxu0 %v729_v0  ;;  %525 = vmatprep.mubr.msk.bf16.mxu0 %vm730_vm0, %v729_v0  ;;  %v582_v3 = vld [vmem:[#allocation5 + $0x10] sm:$0xff]   ;;  %v589_v4 = vld [vmem:[#allocation7] sm:$0xff]   ;;  %v583_v5 = vld [vmem:[#allocation5 + $0x18] sm:$0xff]   ;;  %s731_s29 = smov [#allocation10]  }
  0x4b   :  { %529 = vmatprep.subr.bf16.mxu1 %v729_v0  ;;  %545 = vmatprep.mubr.msk.bf16.mxu1 %vm730_vm0, %v729_v0  ;;  %v590_v6 = vld [vmem:[#allocation7 + $0x8] sm:$0xff]   ;;  %v584_v7 = vld [vmem:[#allocation5 + $0x20] sm:$0xff]   ;;  %v591_v8 = vld [vmem:[#allocation7 + $0x10] sm:$0xff]   ;;  %s440_s30 = sshll.u32 %s731_s29, 4  ;;  %s441_s30 = int_to_ptr.vmem [resolvable:$true] %s440_s30 }
  0x4c   :  { %510 = vmatpush3.bf16.msra.mxu0 %v580_v1  ;;  %530 = vmatpush3.bf16.msra.mxu1 %v589_v4  ;;  %v585_v9 = vld [vmem:[#allocation5 + $0x28] sm:$0xff]   ;;  %v592_v10 = vld [vmem:[#allocation7 + $0x18] sm:$0xff]   ;;  %v586_v11 = vld [vmem:[#allocation5 + $0x30] sm:$0xff]   ;;  %p698_p5 = scmp.lt.s32.totalorder %s441_s30, %s441_s30 }
  0x4d   :  { %511 = vmatprep.subr.bf16.mxu0 %v729_v0  ;;  %531 = vmatprep.subr.bf16.mxu1 %v729_v0  ;;  %v593_v12 = vld [vmem:[#allocation7 + $0x20] sm:$0xff]   ;;  %v587_v13 = vld [vmem:[#allocation5 + $0x38] sm:$0xff]   ;;  %v594_v14 = vld [vmem:[#allocation7 + $0x28] sm:$0xff]  }
  0x4e   :  { %v588_v15 = vld [vmem:[#allocation2] sm:$0xff]   ;;  %v595_v16 = vld [vmem:[#allocation7 + $0x30] sm:$0xff]   ;;  %v597_v18 = vld [vmem:[#allocation8] sm:$0xff]  }
  0x4f   :  { %v596_v17 = vld [vmem:[#allocation7 + $0x38] sm:$0xff]   ;;  %v598_v19 = vld [vmem:[#allocation8 + $0x8] sm:$0xff]   ;;  %v599_v20 = vld [vmem:[#allocation8 + $0x10] sm:$0xff]  }
  0x50   :  { %512 = vmatpush3.bf16.msra.mxu0 %v581_v2  ;;  %532 = vmatpush3.bf16.msra.mxu1 %v590_v6  ;;  %v600_v21 = vld [vmem:[#allocation8 + $0x18] sm:$0xff]   ;;  %v601_v22 = vld [vmem:[#allocation8 + $0x20] sm:$0xff]   ;;  %v602_v23 = vld [vmem:[#allocation8 + $0x28] sm:$0xff]  }
  0x51   :  { %513 = vmatprep.subr.bf16.mxu0 %v729_v0  ;;  %533 = vmatprep.subr.bf16.mxu1 %v729_v0  ;;  %v454_v24 = vld [vmem:[%s901_s2] ss:$0 sm:$0xff]  ;;  %v603_v34 = vld [vmem:[#allocation8 + $0x30] sm:$0xff]  }
  0x52   :  { %v604_v35 = vld [vmem:[#allocation8 + $0x38] sm:$0xff]  }
  0x53   :  { %v464_v36 = vld [vmem:[%s903_s4] ss:$0 sm:$0xff]  ;;  %s693_s4 = scalar_lea.vmem %s441_s30, 256 }
  0x54   :  { %514 = vmatpush3.bf16.msra.mxu0 %v582_v3  ;;  %534 = vmatpush3.bf16.msra.mxu1 %v591_v8  ;;  %v473_v46 = vld [vmem:[%s905_s6] ss:$0 sm:$0xff]  ;;  %p694_p4 = scmp.ne.s32.totalorder %s441_s30, %s693_s4  ;;  %p699_p6 = scmp.lt.s32.totalorder %s693_s4, %s693_s4 }
  0x55   :  { %515 = vmatprep.subr.bf16.mxu0 %v729_v0  ;;  %535 = vmatprep.subr.bf16.mxu1 %v729_v0 }
  0x56   :  { %p700_p7 = por %p699_p6, %p698_p5 }
  0x58   :  { %516 = vmatpush3.bf16.msra.mxu0 %v583_v5  ;;  %536 = vmatpush3.bf16.msra.mxu1 %v592_v10  ;;  %p701_p8 = pnand %p700_p7, %p694_p4 }
  0x59   :  { %517 = vmatprep.subr.bf16.mxu0 %v729_v0  ;;  %537 = vmatprep.subr.bf16.mxu1 %v729_v0 }
  0x5c   :  { %518 = vmatpush3.bf16.msra.mxu0 %v584_v7  ;;  %538 = vmatpush3.bf16.msra.mxu1 %v593_v12 }
  0x5d   :  { %519 = vmatprep.subr.bf16.mxu0 %v729_v0  ;;  %539 = vmatprep.subr.bf16.mxu1 %v729_v0 }
  0x60   :  { %520 = vmatpush3.bf16.msra.mxu0 %v585_v9  ;;  %540 = vmatpush3.bf16.msra.mxu1 %v594_v14 }
  0x61   :  { %521 = vmatprep.subr.bf16.mxu0 %v729_v0  ;;  %541 = vmatprep.subr.bf16.mxu1 %v729_v0 }
  0x64   :  { %522 = vmatpush3.bf16.msra.mxu0 %v586_v11  ;;  %542 = vmatpush3.bf16.msra.mxu1 %v595_v16 }
  0x65   :  { %523 = vmatprep.subr.bf16.mxu0 %v729_v0  ;;  %543 = vmatprep.subr.bf16.mxu1 %v729_v0 }
  0x68   :  { %524 = vmatpush3.bf16.msra.mxu0 %v587_v13  ;;  %544 = vmatpush3.bf16.msra.mxu1 %v596_v17 }
  0x69   :  { %549 = vmatprep.subr.bf16.mxu0 %v729_v0 }
  0x6b   :  { %526 = vmatmul.mubr.bf16.vlgmr.msra.gmra.mrb[0].mxu0 %v588_v15 }
  0x6c   :  { %565 = vmatprep.mubr.msk.bf16.mxu0 %vm730_vm0, %v729_v0  ;;  %550 = vmatpush3.bf16.msra.mxu0 %v597_v18 }
  0x6d   :  { %551 = vmatprep.subr.bf16.mxu0 %v729_v0 }
  0x70   :  { %552 = vmatpush3.bf16.msra.mxu0 %v598_v19 }
  0x71   :  { %553 = vmatprep.subr.bf16.mxu0 %v729_v0 }
  0x74   :  { %554 = vmatpush3.bf16.msra.mxu0 %v599_v20 }
  0x75   :  { %555 = vmatprep.subr.bf16.mxu0 %v729_v0 }
  0x78   :  { %556 = vmatpush3.bf16.msra.mxu0 %v600_v21 }
  0x79   :  { %557 = vmatprep.subr.bf16.mxu0 %v729_v0 }
  0x7c   :  { %558 = vmatpush3.bf16.msra.mxu0 %v601_v22 }
  0x7d   :  { %559 = vmatprep.subr.bf16.mxu0 %v729_v0 }
  0x80   :  { %560 = vmatpush3.bf16.msra.mxu0 %v602_v23 }
  0x81   :  { %561 = vmatprep.subr.bf16.mxu0 %v729_v0 }
  0x84   :  { %562 = vmatpush3.bf16.msra.mxu0 %v603_v34 }
  0x85   :  { %563 = vmatprep.subr.bf16.mxu0 %v729_v0 }
  0x88   :  { %564 = vmatpush3.bf16.msra.mxu0 %v604_v35 }
 0x13e   :  { %v196_v25 = vpop.f32.mrb[0].mxu0 }
 0x13f   :  { %v197_v26 = vadd.f32 %v454_v24, %v196_v25  ;;  %v527_v27 = vpop.f32.mrb[1].mxu0 }
 0x140   :  { %v199_v28 = vpop.f32.mrb[2].mxu0 }
 0x141   :  { %v200_v29 = vadd.f32 %v454_v24, %v199_v28  ;;  %v528_v30 = vpop.f32.mrb[3].mxu0  ;;  %v203_v31 = vmax.f32 %v197_v26, 0.0 }
 0x143   :  { %v204_v32 = vmax.f32 %v200_v29, 0.0 }
 0x145   :  { %v205_v33 = vpack.c.bf16 %v204_v32, %v203_v31 }
 0x147   :  { %546 = vmatmul.mubr.bf16.vlgmr.msra.gmra.mrb[0].mxu1 %v205_v33 }
 0x21a   :  { %v311_v37 = vpop.f32.mrb[0].mxu1 }
 0x21b   :  { %v312_v38 = vadd.f32 %v464_v36, %v311_v37  ;;  %v547_v39 = vpop.f32.mrb[1].mxu1 }
 0x21c   :  { %v314_v40 = vpop.f32.mrb[2].mxu1 }
 0x21d   :  { %v315_v41 = vadd.f32 %v464_v36, %v314_v40  ;;  %v548_v42 = vpop.f32.mrb[3].mxu1  ;;  %v318_v43 = vmax.f32 %v312_v38, 0.0 }
 0x21f   :  { %v319_v44 = vmax.f32 %v315_v41, 0.0 }
 0x221   :  { %v320_v45 = vpack.c.bf16 %v319_v44, %v318_v43 }
 0x223   :  { %566 = vmatmul.mubr.bf16.vlgmr.msra.gmra.mrb[4].mxu0 %v320_v45 }
 0x2f6   :  { %v426_v47 = vpop.f32.mrb[4].mxu0 }
 0x2f7   :  { %v427_v48 = vadd.f32 %v473_v46, %v426_v47  ;;  %v567_v49 = vpop.f32.mrb[5].mxu0 }
 0x2f8   :  { %v429_v50 = vpop.f32.mrb[6].mxu0 }
 0x2f9   :  { %433 = vst [vmem:[#allocation10] sm:$0xff] %v427_v48  ;;  %v430_v51 = vadd.f32 %v473_v46, %v429_v50  ;;  %v568_v52 = vpop.f32.mrb[7].mxu0 }
 0x2fb   :  { %434 = vst [vmem:[#allocation10 + $0x8] sm:$0xff] %v430_v51 }
 0x2fc   :  { %704 = shalt.err (!%p701_p8)
}
 0x2fd   :  { %s705_s9 = scalar_lea.hbm %s906_s7, 256 }
 0x2fe   :  { %p706_p9 = scmp.ne.s32.totalorder %s906_s7, %s705_s9  ;;  %p709_p10 = scmp.lt.u32.totalorder %s705_s9, %s906_s7 }
 0x300   :  { %p711_p11 = pnand %p709_p10, %p706_p9 }
 0x302   :  { %714 = shalt.err (!%p711_p11)
}
 0x303   :  { %s732_s16 = smov 128   ;;  %s733_s0 = smov 8  }
 0x304   :  { %446 = dma.vmem_to_hbm [thread:$0]  %s441_s30, 256, %s906_s7, [#allocation4], %s732_s16, %s732_s16, %s733_s0  }
 0x305   :  { %721 = dma.done.wait [#allocation4], 256  }
 0x306   :  { %722 = vsyncadd [#allocation4], 4294967040 }
 0x307   :  { %450 = vsyncpa [#allocation3], 1 }
 0x308   :  { %451 = vsyncpa [#allocation6], 1 }
 0x309   :  { %452 = vsyncpa [#allocation9], 1 }
 0x30a   :  { %453 = vsyncpa [#allocation4], 1 }

// kernel: tpu_custom_call.1
= control target key start
LH: loop header
LB: loop body
LE: loop exit
PB: predicated region body
PF: predicated region fallthrough
CT: control target
= control target key end

     0   :  { %12 = vsyncpa [#allocation3], 0  ;;  %s899_s0 = inlined_call_operand.hbm [shape: bf16[16,128], index: 0, kind: input, shape index: {}]   ;;  %s900_s1 = inlined_call_operand.hbm [shape: bf16[128,128], index: 1, kind: input, shape index: {}]   ;;  %s901_s2 = inlined_call_operand.vmem [shape: f32[1,128], index: 2, kind: input, shape index: {}]   ;;  %s902_s3 = inlined_call_operand.hbm [shape: bf16[128,128], index: 3, kind: input, shape index: {}]   ;;  %s903_s4 = inlined_call_operand.vmem [shape: f32[1,128], index: 4, kind: input, shape index: {}]   ;;  %s904_s5 = inlined_call_operand.hbm [shape: bf16[128,128], index: 5, kind: input, shape index: {}]   ;;  %s905_s6 = inlined_call_operand.vmem [shape: f32[1,128], index: 6, kind: input, shape index: {}]   ;;  %s906_s7 = inlined_call_operand.hbm [shape: f32[16,128], index: 7, kind: output, shape index: {}]  }
   0x1   :  { %13 = vsyncpa [#allocation6], 0 }
   0x2   :  { %14 = vsyncpa [#allocation9], 0 }
   0x3   :  { %15 = vsyncpa [#allocation4], 0  ;;  %s723_s24 = smov [#allocation5]   ;;  %s724_s26 = smov [#allocation2]  }
   0x4   :  { %s33_s25 = sshll.u32 %s723_s24, 4  ;;  %s21_s27 = sshll.u32 %s724_s26, 4  ;;  %s34_s25 = int_to_ptr.vmem [resolvable:$true] %s33_s25  ;;  %s774_s27 = int_to_ptr.vmem [resolvable:$true] %s21_s27 }
   0x5   :  { %s605_s30 = scalar_lea.hbm %s900_s1, 1024 }
   0x6   :  { %p606_p0 = scmp.ne.s32.totalorder %s900_s1, %s605_s30  ;;  %p609_p1 = scmp.lt.u32.totalorder %s605_s30, %s900_s1 }
   0x8   :  { %p611_p2 = pnand %p609_p1, %p606_p0 }
   0xa   :  { %614 = shalt.err (!%p611_p2)
}
   0xb   :  { %s615_s12 = scalar_lea.vmem %s34_s25, 1024  ;;  %p620_p4 = scmp.lt.s32.totalorder %s34_s25, %s34_s25 }
   0xc   :  { %p616_p3 = scmp.ne.s32.totalorder %s34_s25, %s615_s12  ;;  %p621_p5 = scmp.lt.s32.totalorder %s615_s12, %s615_s12 }
   0xe   :  { %p622_p6 = por %p621_p5, %p620_p4 }
  0x10   :  { %p623_p7 = pnand %p622_p6, %p616_p3 }
  0x12   :  { %626 = shalt.err (!%p623_p7)
}
  0x13   :  { %s725_s13 = smov 64   ;;  %s726_s14 = smov 4  }
  0x14   :  { %39 = dma.hbm_to_vmem [thread:$0]  %s900_s1, 1024, %s34_s25, [#allocation6], %s725_s13, %s725_s13, %s726_s14  }
  0x15   :  { %s627_s19 = scalar_lea.hbm %s899_s0, 128 }
  0x16   :  { %p628_p8 = scmp.ne.s32.totalorder %s899_s0, %s627_s19  ;;  %p631_p9 = scmp.lt.u32.totalorder %s627_s19, %s899_s0 }
  0x18   :  { %p633_p10 = pnand %p631_p9, %p628_p8 }
  0x1a   :  { %636 = shalt.err (!%p633_p10)
}
  0x1b   :  { %s637_s24 = scalar_lea.vmem %s774_s27, 128  ;;  %p642_p12 = scmp.lt.s32.totalorder %s774_s27, %s774_s27 }
  0x1c   :  { %p638_p11 = scmp.ne.s32.totalorder %s774_s27, %s637_s24  ;;  %p643_p13 = scmp.lt.s32.totalorder %s637_s24, %s637_s24 }
  0x1e   :  { %p644_p0 = por %p643_p13, %p642_p12 }
  0x20   :  { %p645_p1 = pnand %p644_p0, %p638_p11 }
  0x22   :  { %648 = shalt.err (!%p645_p1)
}
  0x23   :  { %27 = dma.hbm_to_vmem [thread:$0]  %s899_s0, 128, %s774_s27, [#allocation3], %s725_s13, %s725_s13, %s726_s14  }
  0x24   :  { %s727_s26 = smov [#allocation7]   ;;  %s728_s29 = smov [#allocation8]  }
  0x25   :  { %s47_s28 = sshll.u32 %s727_s26, 4  ;;  %s61_s30 = sshll.u32 %s728_s29, 4  ;;  %s48_s28 = int_to_ptr.vmem [resolvable:$true] %s47_s28  ;;  %s811_s30 = int_to_ptr.vmem [resolvable:$true] %s61_s30 }
  0x26   :  { %s649_s10 = scalar_lea.hbm %s902_s3, 1024 }
  0x27   :  { %p650_p2 = scmp.ne.s32.totalorder %s902_s3, %s649_s10  ;;  %p653_p3 = scmp.lt.u32.totalorder %s649_s10, %s902_s3 }
  0x29   :  { %p655_p4 = pnand %p653_p3, %p650_p2 }
  0x2b   :  { %658 = shalt.err (!%p655_p4)
}
  0x2c   :  { %s659_s0 = scalar_lea.vmem %s48_s28, 1024  ;;  %p664_p6 = scmp.lt.s32.totalorder %s48_s28, %s48_s28 }
  0x2d   :  { %p660_p5 = scmp.ne.s32.totalorder %s48_s28, %s659_s0  ;;  %p665_p7 = scmp.lt.s32.totalorder %s659_s0, %s659_s0 }
  0x2f   :  { %p666_p8 = por %p665_p7, %p664_p6 }
  0x31   :  { %p667_p9 = pnand %p666_p8, %p660_p5 }
  0x33   :  { %670 = shalt.err (!%p667_p9)
}
  0x34   :  { %53 = dma.hbm_to_vmem [thread:$0]  %s902_s3, 1024, %s48_s28, [#allocation6], %s725_s13, %s725_s13, %s726_s14  }
  0x35   :  { %s671_s20 = scalar_lea.hbm %s904_s5, 1024 }
  0x36   :  { %p672_p10 = scmp.ne.s32.totalorder %s904_s5, %s671_s20  ;;  %p675_p11 = scmp.lt.u32.totalorder %s671_s20, %s904_s5 }
  0x38   :  { %p677_p12 = pnand %p675_p11, %p672_p10 }
  0x3a   :  { %680 = shalt.err (!%p677_p12)
}
  0x3b   :  { %s681_s1 = scalar_lea.vmem %s811_s30, 1024  ;;  %p686_p0 = scmp.lt.s32.totalorder %s811_s30, %s811_s30 }
  0x3c   :  { %p682_p13 = scmp.ne.s32.totalorder %s811_s30, %s681_s1  ;;  %p687_p1 = scmp.lt.s32.totalorder %s681_s1, %s681_s1 }
  0x3e   :  { %p688_p2 = por %p687_p1, %p686_p0 }
  0x40   :  { %p689_p3 = pnand %p688_p2, %p682_p13 }
  0x42   :  { %692 = shalt.err (!%p689_p3)
}
  0x43   :  { %67 = dma.hbm_to_vmem [thread:$0]  %s904_s5, 1024, %s811_s30, [#allocation9], %s725_s13, %s725_s13, %s726_s14  }
  0x44   :  { %715 = dma.done.wait [#allocation3], 128  }
  0x45   :  { %716 = vsyncadd [#allocation3], 4294967168 }
  0x46   :  { %717 = dma.done.wait [#allocation6], 2048  }
  0x47   :  { %718 = vsyncadd [#allocation6], 4294965248 }
  0x48   :  { %719 = dma.done.wait [#allocation9], 1024  }
  0x49   :  { %720 = vsyncadd [#allocation9], 4294966272  ;;  %v729_v0 = vmov 0.0   ;;  %vm730_vm0 = vmmov 0   ;;  %v580_v1 = vld [vmem:[#allocation5] sm:$0xff]   ;;  %v581_v2 = vld [vmem:[#allocation5 + $0x8] sm:$0xff]  }
  0x4a   :  { %509 = vmatprep.subr.bf16.mxu0 %v729_v0  ;;  %525 = vmatprep.mubr.msk.bf16.mxu0 %vm730_vm0, %v729_v0  ;;  %v582_v3 = vld [vmem:[#allocation5 + $0x10] sm:$0xff]   ;;  %v589_v4 = vld [vmem:[#allocation7] sm:$0xff]   ;;  %v583_v5 = vld [vmem:[#allocation5 + $0x18] sm:$0xff]   ;;  %s731_s29 = smov [#allocation10]  }
  0x4b   :  { %529 = vmatprep.subr.bf16.mxu1 %v729_v0  ;;  %545 = vmatprep.mubr.msk.bf16.mxu1 %vm730_vm0, %v729_v0  ;;  %v590_v6 = vld [vmem:[#allocation7 + $0x8] sm:$0xff]   ;;  %v584_v7 = vld [vmem:[#allocation5 + $0x20] sm:$0xff]   ;;  %v591_v8 = vld [vmem:[#allocation7 + $0x10] sm:$0xff]   ;;  %s440_s30 = sshll.u32 %s731_s29, 4  ;;  %s441_s30 = int_to_ptr.vmem [resolvable:$true] %s440_s30 }
  0x4c   :  { %510 = vmatpush3.bf16.msra.mxu0 %v580_v1  ;;  %530 = vmatpush3.bf16.msra.mxu1 %v589_v4  ;;  %v585_v9 = vld [vmem:[#allocation5 + $0x28] sm:$0xff]   ;;  %v592_v10 = vld [vmem:[#allocation7 + $0x18] sm:$0xff]   ;;  %v586_v11 = vld [vmem:[#allocation5 + $0x30] sm:$0xff]   ;;  %p698_p5 = scmp.lt.s32.totalorder %s441_s30, %s441_s30 }
  0x4d   :  { %511 = vmatprep.subr.bf16.mxu0 %v729_v0  ;;  %531 = vmatprep.subr.bf16.mxu1 %v729_v0  ;;  %v593_v12 = vld [vmem:[#allocation7 + $0x20] sm:$0xff]   ;;  %v587_v13 = vld [vmem:[#allocation5 + $0x38] sm:$0xff]   ;;  %v594_v14 = vld [vmem:[#allocation7 + $0x28] sm:$0xff]  }
  0x4e   :  { %v588_v15 = vld [vmem:[#allocation2] sm:$0xff]   ;;  %v595_v16 = vld [vmem:[#allocation7 + $0x30] sm:$0xff]   ;;  %v597_v18 = vld [vmem:[#allocation8] sm:$0xff]  }
  0x4f   :  { %v596_v17 = vld [vmem:[#allocation7 + $0x38] sm:$0xff]   ;;  %v598_v19 = vld [vmem:[#allocation8 + $0x8] sm:$0xff]   ;;  %v599_v20 = vld [vmem:[#allocation8 + $0x10] sm:$0xff]  }
  0x50   :  { %512 = vmatpush3.bf16.msra.mxu0 %v581_v2  ;;  %532 = vmatpush3.bf16.msra.mxu1 %v590_v6  ;;  %v600_v21 = vld [vmem:[#allocation8 + $0x18] sm:$0xff]   ;;  %v601_v22 = vld [vmem:[#allocation8 + $0x20] sm:$0xff]   ;;  %v602_v23 = vld [vmem:[#allocation8 + $0x28] sm:$0xff]  }
  0x51   :  { %513 = vmatprep.subr.bf16.mxu0 %v729_v0  ;;  %533 = vmatprep.subr.bf16.mxu1 %v729_v0  ;;  %v454_v24 = vld [vmem:[%s901_s2] ss:$0 sm:$0xff]  ;;  %v603_v34 = vld [vmem:[#allocation8 + $0x30] sm:$0xff]  }
  0x52   :  { %v604_v35 = vld [vmem:[#allocation8 + $0x38] sm:$0xff]  }
  0x53   :  { %v464_v36 = vld [vmem:[%s903_s4] ss:$0 sm:$0xff]  ;;  %s693_s4 = scalar_lea.vmem %s441_s30, 256 }
  0x54   :  { %514 = vmatpush3.bf16.msra.mxu0 %v582_v3  ;;  %534 = vmatpush3.bf16.msra.mxu1 %v591_v8  ;;  %v473_v46 = vld [vmem:[%s905_s6] ss:$0 sm:$0xff]  ;;  %p694_p4 = scmp.ne.s32.totalorder %s441_s30, %s693_s4  ;;  %p699_p6 = scmp.lt.s32.totalorder %s693_s4, %s693_s4 }
  0x55   :  { %515 = vmatprep.subr.bf16.mxu0 %v729_v0  ;;  %535 = vmatprep.subr.bf16.mxu1 %v729_v0 }
  0x56   :  { %p700_p7 = por %p699_p6, %p698_p5 }
  0x58   :  { %516 = vmatpush3.bf16.msra.mxu0 %v583_v5  ;;  %536 = vmatpush3.bf16.msra.mxu1 %v592_v10  ;;  %p701_p8 = pnand %p700_p7, %p694_p4 }
  0x59   :  { %517 = vmatprep.subr.bf16.mxu0 %v729_v0  ;;  %537 = vmatprep.subr.bf16.mxu1 %v729_v0 }
  0x5c   :  { %518 = vmatpush3.bf16.msra.mxu0 %v584_v7  ;;  %538 = vmatpush3.bf16.msra.mxu1 %v593_v12 }
  0x5d   :  { %519 = vmatprep.subr.bf16.mxu0 %v729_v0  ;;  %539 = vmatprep.subr.bf16.mxu1 %v729_v0 }
  0x60   :  { %520 = vmatpush3.bf16.msra.mxu0 %v585_v9  ;;  %540 = vmatpush3.bf16.msra.mxu1 %v594_v14 }
  0x61   :  { %521 = vmatprep.subr.bf16.mxu0 %v729_v0  ;;  %541 = vmatprep.subr.bf16.mxu1 %v729_v0 }
  0x64   :  { %522 = vmatpush3.bf16.msra.mxu0 %v586_v11  ;;  %542 = vmatpush3.bf16.msra.mxu1 %v595_v16 }
  0x65   :  { %523 = vmatprep.subr.bf16.mxu0 %v729_v0  ;;  %543 = vmatprep.subr.bf16.mxu1 %v729_v0 }
  0x68   :  { %524 = vmatpush3.bf16.msra.mxu0 %v587_v13  ;;  %544 = vmatpush3.bf16.msra.mxu1 %v596_v17 }
  0x69   :  { %549 = vmatprep.subr.bf16.mxu0 %v729_v0 }
  0x6b   :  { %526 = vmatmul.mubr.bf16.vlgmr.msra.gmra.mrb[0].mxu0 %v588_v15 }
  0x6c   :  { %565 = vmatprep.mubr.msk.bf16.mxu0 %vm730_vm0, %v729_v0  ;;  %550 = vmatpush3.bf16.msra.mxu0 %v597_v18 }
  0x6d   :  { %551 = vmatprep.subr.bf16.mxu0 %v729_v0 }
  0x70   :  { %552 = vmatpush3.bf16.msra.mxu0 %v598_v19 }
  0x71   :  { %553 = vmatprep.subr.bf16.mxu0 %v729_v0 }
  0x74   :  { %554 = vmatpush3.bf16.msra.mxu0 %v599_v20 }
  0x75   :  { %555 = vmatprep.subr.bf16.mxu0 %v729_v0 }
  0x78   :  { %556 = vmatpush3.bf16.msra.mxu0 %v600_v21 }
  0x79   :  { %557 = vmatprep.subr.bf16.mxu0 %v729_v0 }
  0x7c   :  { %558 = vmatpush3.bf16.msra.mxu0 %v601_v22 }
  0x7d   :  { %559 = vmatprep.subr.bf16.mxu0 %v729_v0 }
  0x80   :  { %560 = vmatpush3.bf16.msra.mxu0 %v602_v23 }
  0x81   :  { %561 = vmatprep.subr.bf16.mxu0 %v729_v0 }
  0x84   :  { %562 = vmatpush3.bf16.msra.mxu0 %v603_v34 }
  0x85   :  { %563 = vmatprep.subr.bf16.mxu0 %v729_v0 }
  0x88   :  { %564 = vmatpush3.bf16.msra.mxu0 %v604_v35 }
 0x13e   :  { %v196_v25 = vpop.f32.mrb[0].mxu0 }
 0x13f   :  { %v197_v26 = vadd.f32 %v454_v24, %v196_v25  ;;  %v527_v27 = vpop.f32.mrb[1].mxu0 }
 0x140   :  { %v199_v28 = vpop.f32.mrb[2].mxu0 }
 0x141   :  { %v200_v29 = vadd.f32 %v454_v24, %v199_v28  ;;  %v528_v30 = vpop.f32.mrb[3].mxu0  ;;  %v203_v31 = vmax.f32 %v197_v26, 0.0 }
 0x143   :  { %v204_v32 = vmax.f32 %v200_v29, 0.0 }
 0x145   :  { %v205_v33 = vpack.c.bf16 %v204_v32, %v203_v31 }
 0x147   :  { %546 = vmatmul.mubr.bf16.vlgmr.msra.gmra.mrb[0].mxu1 %v205_v33 }
 0x21a   :  { %v311_v37 = vpop.f32.mrb[0].mxu1 }
 0x21b   :  { %v312_v38 = vadd.f32 %v464_v36, %v311_v37  ;;  %v547_v39 = vpop.f32.mrb[1].mxu1 }
 0x21c   :  { %v314_v40 = vpop.f32.mrb[2].mxu1 }
 0x21d   :  { %v315_v41 = vadd.f32 %v464_v36, %v314_v40  ;;  %v548_v42 = vpop.f32.mrb[3].mxu1  ;;  %v318_v43 = vmax.f32 %v312_v38, 0.0 }
 0x21f   :  { %v319_v44 = vmax.f32 %v315_v41, 0.0 }
 0x221   :  { %v320_v45 = vpack.c.bf16 %v319_v44, %v318_v43 }
 0x223   :  { %566 = vmatmul.mubr.bf16.vlgmr.msra.gmra.mrb[4].mxu0 %v320_v45 }
 0x2f6   :  { %v426_v47 = vpop.f32.mrb[4].mxu0 }
 0x2f7   :  { %v427_v48 = vadd.f32 %v473_v46, %v426_v47  ;;  %v567_v49 = vpop.f32.mrb[5].mxu0 }
 0x2f8   :  { %v429_v50 = vpop.f32.mrb[6].mxu0 }
 0x2f9   :  { %433 = vst [vmem:[#allocation10] sm:$0xff] %v427_v48  ;;  %v430_v51 = vadd.f32 %v473_v46, %v429_v50  ;;  %v568_v52 = vpop.f32.mrb[7].mxu0 }
 0x2fb   :  { %434 = vst [vmem:[#allocation10 + $0x8] sm:$0xff] %v430_v51 }
 0x2fc   :  { %704 = shalt.err (!%p701_p8)
}
 0x2fd   :  { %s705_s9 = scalar_lea.hbm %s906_s7, 256 }
 0x2fe   :  { %p706_p9 = scmp.ne.s32.totalorder %s906_s7, %s705_s9  ;;  %p709_p10 = scmp.lt.u32.totalorder %s705_s9, %s906_s7 }
 0x300   :  { %p711_p11 = pnand %p709_p10, %p706_p9 }
 0x302   :  { %714 = shalt.err (!%p711_p11)
}
 0x303   :  { %s732_s16 = smov 128   ;;  %s733_s0 = smov 8  }
 0x304   :  { %446 = dma.vmem_to_hbm [thread:$0]  %s441_s30, 256, %s906_s7, [#allocation4], %s732_s16, %s732_s16, %s733_s0  }
 0x305   :  { %721 = dma.done.wait [#allocation4], 256  }
 0x306   :  { %722 = vsyncadd [#allocation4], 4294967040 }
 0x307   :  { %450 = vsyncpa [#allocation3], 1 }
 0x308   :  { %451 = vsyncpa [#allocation6], 1 }
 0x309   :  { %452 = vsyncpa [#allocation9], 1 }
 0x30a   :  { %453 = vsyncpa [#allocation4], 1 }

// kernel: tpu_custom_call.1
= control target key start
LH: loop header
LB: loop body
LE: loop exit
PB: predicated region body
PF: predicated region fallthrough
CT: control target
= control target key end

     0   :  { %8 = vsyncpa [#allocation4], 0  ;;  %s424_s0 = inlined_call_operand.hbm [shape: bf16[16,128], index: 0, kind: input, shape index: {}]   ;;  %s425_s1 = inlined_call_operand.hbm [shape: bf16[128,128], index: 1, kind: input, shape index: {}]   ;;  %s426_s2 = inlined_call_operand.vmem [shape: f32[1,128], index: 2, kind: input, shape index: {}]   ;;  %s427_s3 = inlined_call_operand.hbm [shape: bf16[16,128], index: 3, kind: output, shape index: {}]  }
   0x1   :  { %9 = vsyncpa [#allocation7], 0 }
   0x2   :  { %10 = vsyncpa [#allocation5], 0  ;;  %s349_s12 = smov [#allocation3]   ;;  %s277_s16 = scalar_lea.hbm %s424_s0, 128 }
   0x3   :  { %s16_s13 = sshll.u32 %s349_s12, 4  ;;  %p278_p0 = scmp.ne.s32.totalorder %s424_s0, %s277_s16  ;;  %s17_s13 = int_to_ptr.vmem [resolvable:$true] %s16_s13 }
   0x4   :  { %p281_p1 = scmp.lt.u32.totalorder %s277_s16, %s424_s0 }
   0x6   :  { %p283_p2 = pnand %p281_p1, %p278_p0 }
   0x8   :  { %286 = shalt.err (!%p283_p2)
}
   0x9   :  { %s287_s21 = scalar_lea.vmem %s17_s13, 128  ;;  %p292_p4 = scmp.lt.s32.totalorder %s17_s13, %s17_s13 }
   0xa   :  { %p288_p3 = scmp.ne.s32.totalorder %s17_s13, %s287_s21  ;;  %p293_p5 = scmp.lt.s32.totalorder %s287_s21, %s287_s21 }
   0xc   :  { %p294_p6 = por %p293_p5, %p292_p4 }
   0xe   :  { %p295_p7 = pnand %p294_p6, %p288_p3 }
  0x10   :  { %298 = shalt.err (!%p295_p7)
}
  0x11   :  { %s350_s22 = smov 64   ;;  %s351_s23 = smov 4  }
  0x12   :  { %22 = dma.hbm_to_vmem [thread:$0]  %s424_s0, 128, %s17_s13, [#allocation4], %s350_s22, %s350_s22, %s351_s23  }
  0x13   :  { %s352_s26 = smov [#allocation6]   ;;  %s299_s30 = scalar_lea.hbm %s425_s1, 1024 }
  0x14   :  { %s28_s27 = sshll.u32 %s352_s26, 4  ;;  %p300_p8 = scmp.ne.s32.totalorder %s425_s1, %s299_s30  ;;  %s29_s27 = int_to_ptr.vmem [resolvable:$true] %s28_s27 }
  0x15   :  { %p303_p9 = scmp.lt.u32.totalorder %s299_s30, %s425_s1 }
  0x17   :  { %p305_p10 = pnand %p303_p9, %p300_p8 }
  0x19   :  { %308 = shalt.err (!%p305_p10)
}
  0x1a   :  { %s309_s8 = scalar_lea.vmem %s29_s27, 1024  ;;  %p314_p12 = scmp.lt.s32.totalorder %s29_s27, %s29_s27 }
  0x1b   :  { %p310_p11 = scmp.ne.s32.totalorder %s29_s27, %s309_s8  ;;  %p315_p13 = scmp.lt.s32.totalorder %s309_s8, %s309_s8 }
  0x1d   :  { %p316_p0 = por %p315_p13, %p314_p12 }
  0x1f   :  { %p317_p1 = pnand %p316_p0, %p310_p11 }
  0x21   :  { %320 = shalt.err (!%p317_p1)
}
  0x22   :  { %34 = dma.hbm_to_vmem [thread:$0]  %s425_s1, 1024, %s29_s27, [#allocation7], %s350_s22, %s350_s22, %s351_s23  }
  0x23   :  { %343 = dma.done.wait [#allocation4], 128  }
  0x24   :  { %344 = vsyncadd [#allocation4], 4294967168 }
  0x25   :  { %345 = dma.done.wait [#allocation7], 1024  }
  0x26   :  { %346 = vsyncadd [#allocation7], 4294966272  ;;  %v353_v0 = vmov 0.0   ;;  %vm354_vm0 = vmmov 0   ;;  %v268_v1 = vld [vmem:[#allocation6] sm:$0xff]   ;;  %v269_v2 = vld [vmem:[#allocation6 + $0x8] sm:$0xff]  }
  0x27   :  { %241 = vmatprep.subr.bf16.mxu0 %v353_v0  ;;  %257 = vmatprep.mubr.msk.bf16.mxu0 %vm354_vm0, %v353_v0  ;;  %v270_v3 = vld [vmem:[#allocation6 + $0x10] sm:$0xff]   ;;  %v271_v4 = vld [vmem:[#allocation6 + $0x18] sm:$0xff]   ;;  %v272_v5 = vld [vmem:[#allocation6 + $0x20] sm:$0xff]   ;;  %s355_s11 = smov [#allocation8]  }
  0x28   :  { %242 = vmatpush3.bf16.msra.mxu0 %v268_v1  ;;  %v273_v6 = vld [vmem:[#allocation6 + $0x28] sm:$0xff]   ;;  %v274_v7 = vld [vmem:[#allocation6 + $0x30] sm:$0xff]   ;;  %v275_v8 = vld [vmem:[#allocation6 + $0x38] sm:$0xff]   ;;  %s200_s12 = sshll.u32 %s355_s11, 4  ;;  %s201_s12 = int_to_ptr.vmem [resolvable:$true] %s200_s12 }
  0x29   :  { %243 = vmatprep.subr.bf16.mxu0 %v353_v0  ;;  %v276_v9 = vld [vmem:[#allocation3] sm:$0xff]   ;;  %s321_s13 = scalar_lea.vmem %s201_s12, 128  ;;  %p326_p3 = scmp.lt.s32.totalorder %s201_s12, %s201_s12 }
  0x2a   :  { %v222_v10 = vld [vmem:[%s426_s2] ss:$0 sm:$0xff]  ;;  %p322_p2 = scmp.ne.s32.totalorder %s201_s12, %s321_s13  ;;  %p327_p4 = scmp.lt.s32.totalorder %s321_s13, %s321_s13 }
  0x2c   :  { %244 = vmatpush3.bf16.msra.mxu0 %v269_v2  ;;  %p328_p5 = por %p327_p4, %p326_p3 }
  0x2d   :  { %245 = vmatprep.subr.bf16.mxu0 %v353_v0 }
  0x2e   :  { %p329_p6 = pnand %p328_p5, %p322_p2 }
  0x30   :  { %246 = vmatpush3.bf16.msra.mxu0 %v270_v3 }
  0x31   :  { %247 = vmatprep.subr.bf16.mxu0 %v353_v0 }
  0x34   :  { %248 = vmatpush3.bf16.msra.mxu0 %v271_v4 }
  0x35   :  { %249 = vmatprep.subr.bf16.mxu0 %v353_v0 }
  0x38   :  { %250 = vmatpush3.bf16.msra.mxu0 %v272_v5 }
  0x39   :  { %251 = vmatprep.subr.bf16.mxu0 %v353_v0 }
  0x3c   :  { %252 = vmatpush3.bf16.msra.mxu0 %v273_v6 }
  0x3d   :  { %253 = vmatprep.subr.bf16.mxu0 %v353_v0 }
  0x40   :  { %254 = vmatpush3.bf16.msra.mxu0 %v274_v7 }
  0x41   :  { %255 = vmatprep.subr.bf16.mxu0 %v353_v0 }
  0x44   :  { %256 = vmatpush3.bf16.msra.mxu0 %v275_v8 }
  0x47   :  { %258 = vmatmul.mubr.bf16.vlgmr.msra.gmra.mrb[0].mxu0 %v276_v9 }
 0x11a   :  { %v158_v11 = vpop.f32.mrb[0].mxu0 }
 0x11b   :  { %v181_v12 = vadd.f32 %v222_v10, %v158_v11  ;;  %v259_v13 = vpop.f32.mrb[1].mxu0 }
 0x11c   :  { %v161_v14 = vpop.f32.mrb[2].mxu0 }
 0x11d   :  { %v182_v15 = vadd.f32 %v222_v10, %v161_v14  ;;  %v260_v16 = vpop.f32.mrb[3].mxu0  ;;  %v183_v17 = vmax.f32 %v181_v12, 0.0 }
 0x11f   :  { %v184_v18 = vmax.f32 %v182_v15, 0.0 }
 0x121   :  { %v230_v19 = vpack.c.bf16 %v184_v18, %v183_v17 }
 0x123   :  { %231 = vst [vmem:[#allocation8] sm:$0xff] %v230_v19  }
 0x124   :  { %332 = shalt.err (!%p329_p6)
}
 0x125   :  { %s333_s15 = scalar_lea.hbm %s427_s3, 128 }
 0x126   :  { %p334_p7 = scmp.ne.s32.totalorder %s427_s3, %s333_s15  ;;  %p337_p8 = scmp.lt.u32.totalorder %s333_s15, %s427_s3 }
 0x128   :  { %p339_p9 = pnand %p337_p8, %p334_p7 }
 0x12a   :  { %342 = shalt.err (!%p339_p9)
}
 0x12b   :  { %206 = dma.vmem_to_hbm [thread:$0]  %s201_s12, 128, %s427_s3, [#allocation5], %s350_s22, %s350_s22, %s351_s23  }
 0x12c   :  { %347 = dma.done.wait [#allocation5], 128  }
 0x12d   :  { %348 = vsyncadd [#allocation5], 4294967168 }
 0x12e   :  { %210 = vsyncpa [#allocation4], 1 }
 0x12f   :  { %211 = vsyncpa [#allocation7], 1 }
 0x130   :  { %212 = vsyncpa [#allocation5], 1 }

</bundles_post_ra>
